<compile_context>
chip_gen: v7x
topology: tpu7x:2x2x1
jax: 0.10.0
libtpu: 0.0.40
codegen_flags: <defaults>
</compile_context>

<pallas_src>
import functools

import jax
import jax.numpy as jnp
from jax.experimental import pallas as pl
from jax.experimental.pallas import tpu as pltpu


def _round_up(x, m):
    return ((x + m - 1) // m) * m


def _ce_label_smooth_kernel(
    logits_ref, targets_ref, partial_ref, *, epsilon, num_classes, n_rows, tile_n
):
    # logits_ref:  (tile_n, C) VMEM block (f32 or bf16)
    # targets_ref: (tile_n, 1) int32 VMEM block
    # partial_ref: (1, 1, 1)   f32 VMEM output block (per-grid-step partial sum)
    i = pl.program_id(0)

    x = logits_ref[...]          # native dtype; upcast per-consumer below
    t = targets_ref[...]         # (tile_n, 1) int32

    # --- log normalizer: z = max + log-sum-exp (per row) ---------------------
    m = jnp.max(x, axis=1, keepdims=True).astype(jnp.float32)             # (tile_n, 1)
    p = jnp.exp(x.astype(jnp.float32) - m)                                # (tile_n, C)
    z = m + jnp.log(jnp.sum(p, axis=1, keepdims=True))                    # (tile_n, 1)

    # --- fused smoothed-target weighted reduction ----------------------------
    classes = jax.lax.broadcasted_iota(jnp.int32, (1, num_classes), 1)    # (1, C)
    base_w = jnp.float32(epsilon / num_classes)
    hit_w = jnp.float32(1.0 - epsilon + epsilon / num_classes)
    w = jnp.where(classes == t, hit_w, base_w)                            # (tile_n, C)
    weighted = jnp.sum(w * x.astype(jnp.float32), axis=1, keepdims=True)  # (tile_n, 1)

    per_row = z - weighted                                                # (tile_n, 1)

    # Mask rows past the true batch end (last block may read OOB garbage rows).
    row_ids = i * tile_n + jax.lax.broadcasted_iota(jnp.int32, per_row.shape, 0)
    per_row = jnp.where(row_ids < n_rows, per_row, 0.0)

    partial_ref[...] = jnp.sum(per_row, keepdims=True).reshape(1, 1, 1)


def _choose_tile_n(n, c, itemsize, vmem_budget_bytes):
    """Largest row tile whose estimated VMEM footprint fits the budget."""
    c_lanes = _round_up(c, 128)
    # Per-row bytes: 2x double-buffered logits block + ~3 f32 block-sized
    # temporaries (exp / weights / products) + 2x 128-lane-padded int32 targets.
    bytes_per_row = 2 * c_lanes * itemsize + 3 * c_lanes * 4 + 2 * 128 * 4
    tile = vmem_budget_bytes // bytes_per_row
    tile = int(max(8, min(tile, 8192, _round_up(n, 8))))
    return tile - tile % 8


def cross_entropy_label_smooth(logits, targets, *, epsilon, tile_n=None):
    """logits: (N, C) float (f32 or bf16), targets: (N,) int -> scalar f32 loss."""
    n, c = logits.shape
    itemsize = jnp.dtype(logits.dtype).itemsize

    if tile_n is None:
        tile_n = _choose_tile_n(n, c, itemsize, 24 * 1024 * 1024)
    else:
        tile_n = int(max(8, min(int(tile_n), _round_up(n, 8))))
        tile_n -= tile_n % 8

    num_blocks = int(pl.cdiv(n, tile_n))
    padded_rows = num_blocks * tile_n

    # Only the tiny targets array is padded; logits stream straight from HBM.
    targets_2d = targets.astype(jnp.int32).reshape(n, 1)
    if padded_rows != n:
        targets_2d = jnp.pad(targets_2d, ((0, padded_rows - n), (0, 0)))

    kernel = functools.partial(
        _ce_label_smooth_kernel,
        epsilon=float(epsilon),
        num_classes=int(c),
        n_rows=int(n),
        tile_n=int(tile_n),
    )

    grid_spec = pltpu.PrefetchScalarGridSpec(
        num_scalar_prefetch=0,
        grid=(num_blocks,),
        in_specs=[
            pl.BlockSpec((tile_n, c), lambda i: (i, 0)),
            pl.BlockSpec((tile_n, 1), lambda i: (i, 0)),
        ],
        out_specs=pl.BlockSpec((1, 1, 1), lambda i: (i, 0, 0)),
    )

    partials = pl.pallas_call(
        kernel,
        out_shape=jax.ShapeDtypeStruct((num_blocks, 1, 1), jnp.float32),
        grid_spec=grid_spec,
        compiler_params=pltpu.CompilerParams(
            # Race-free: each grid step owns its own output block -> megacore OK.
            dimension_semantics=("parallel",),
            vmem_limit_bytes=32 * 1024 * 1024,
        ),
        cost_estimate=pl.CostEstimate(
            flops=6 * n * c,
            transcendentals=n * c,
            bytes_accessed=n * c * itemsize + padded_rows * 4 + num_blocks * 4,
        ),
    )(logits, targets_2d)

    # Tiny final reduction (num_blocks values) + divide by the true N in JAX.
    return jnp.sum(partials) / jnp.float32(n)


def _reference(logits, targets, epsilon):
    num_classes = logits.shape[1]
    log_probs = jax.nn.log_softmax(logits.astype(jnp.float32), axis=1)
    one_hot = jax.nn.one_hot(targets, num_classes, dtype=jnp.float32)
    smoothed = (1.0 - epsilon) * one_hot + epsilon / num_classes
    return jnp.sum(jnp.mean(-smoothed * log_probs, axis=0))


if __name__ == "__main__":
    key = jax.random.PRNGKey(0)
    k_logits, k_targets = jax.random.split(key)
    N, C = 30, 256
    epsilon = 0.1

    logits = jax.random.normal(k_logits, (N, C), dtype=jnp.float32)
    targets = jax.random.randint(k_targets, (N,), 0, C, dtype=jnp.int32)

    ref = jax.block_until_ready(_reference(logits, targets, epsilon))

    # Forced small tile: 2 grid steps + a partially out-of-bounds last block
    # (exercises the no-pad / row-mask path).
    loss_small = jax.block_until_ready(
        cross_entropy_label_smooth(logits, targets, epsilon=epsilon, tile_n=16)
    )
    assert jnp.allclose(loss_small, ref, rtol=1e-5, atol=1e-5), (loss_small, ref)

    # Auto (VMEM-budget-derived) tile path.
    loss_auto = jax.block_until_ready(
        cross_entropy_label_smooth(logits, targets, epsilon=epsilon)
    )
    assert jnp.allclose(loss_auto, ref, rtol=1e-5, atol=1e-5), (loss_auto, ref)

    # bf16 input path (per-consumer upcast inside the kernel).
    logits_bf16 = logits.astype(jnp.bfloat16)
    loss_bf16 = jax.block_until_ready(
        cross_entropy_label_smooth(logits_bf16, targets, epsilon=epsilon)
    )
    ref_bf16 = jax.block_until_ready(_reference(logits_bf16, targets, epsilon))
    assert jnp.allclose(loss_bf16, ref_bf16, rtol=2e-2, atol=2e-2), (loss_bf16, ref_bf16)

    print("KERNEL_OK")
</pallas_src>

<mosaic_0001>
module attributes {stable_mosaic.version = 11 : i64} {
  func.func @_ce_label_smooth_kernel(%arg0: i32, %arg1: memref<16x256xf32, #tpu.memory_space<vmem>>, %arg2: memref<16x1xi32, #tpu.memory_space<vmem>>, %arg3: memref<1x1x1xf32, #tpu.memory_space<vmem>>) attributes {dimension_semantics = [#tpu.dimension_semantics<parallel>], iteration_bounds = array<i64: 2>, scalar_prefetch = 0 : i64, scratch_operands = 0 : i64, tpu.core_type = #tpu.core_type<tc>, window_params = [{transform_indices = @transform_0, window_bounds = array<i64: 16, 256>}, {transform_indices = @transform_1, window_bounds = array<i64: 16, 1>}, {transform_indices = @transform_2, window_bounds = array<i64: 1, 1, 1>}]} {
    %c0 = arith.constant 0 : index
    %c0_0 = arith.constant 0 : index
    %0 = vector.load %arg1[%c0, %c0_0] : memref<16x256xf32, #tpu.memory_space<vmem>>, vector<16x256xf32>
    %c0_1 = arith.constant 0 : index
    %c0_2 = arith.constant 0 : index
    %1 = vector.load %arg2[%c0_1, %c0_2] : memref<16x1xi32, #tpu.memory_space<vmem>>, vector<16x1xi32>
    %cst = arith.constant dense<0xFF800000> : vector<16xf32>
    %2 = vector.multi_reduction <maximumf>, %0, %cst [1] : vector<16x256xf32> to vector<16xf32>
    %3 = vector.shape_cast %2 : vector<16xf32> to vector<16x1xf32>
    %4 = vector.broadcast %3 : vector<16x1xf32> to vector<16x256xf32>
    %5 = arith.subf %0, %4 : vector<16x256xf32>
    %6 = math.exp %5 : vector<16x256xf32>
    %cst_3 = arith.constant dense<0.000000e+00> : vector<16xf32>
    %7 = vector.multi_reduction <add>, %6, %cst_3 [1] : vector<16x256xf32> to vector<16xf32>
    %8 = vector.shape_cast %7 : vector<16xf32> to vector<16x1xf32>
    %9 = math.log %8 : vector<16x1xf32>
    %10 = arith.addf %3, %9 : vector<16x1xf32>
    %11 = tpu.iota {dimensions = array<i32: 1>} : vector<1x256xi32>
    %12 = vector.broadcast %11 : vector<1x256xi32> to vector<16x256xi32>
    %13 = vector.broadcast %1 : vector<16x1xi32> to vector<16x256xi32>
    %14 = arith.cmpi eq, %12, %13 : vector<16x256xi32>
    %cst_4 = arith.constant 0.900390625 : f32
    %cst_5 = arith.constant 3.906250e-04 : f32
    %15 = vector.broadcast %cst_4 : f32 to vector<16x256xf32>
    %16 = vector.broadcast %cst_5 : f32 to vector<16x256xf32>
    %17 = arith.select %14, %15, %16 : vector<16x256xi1>, vector<16x256xf32>
    %18 = arith.mulf %17, %0 : vector<16x256xf32>
    %cst_6 = arith.constant dense<0.000000e+00> : vector<16xf32>
    %19 = vector.multi_reduction <add>, %18, %cst_6 [1] : vector<16x256xf32> to vector<16xf32>
    %20 = vector.shape_cast %19 : vector<16xf32> to vector<16x1xf32>
    %21 = arith.subf %10, %20 : vector<16x1xf32>
    %c16_i32 = arith.constant 16 : i32
    %22 = arith.muli %arg0, %c16_i32 : i32
    %23 = tpu.iota {dimensions = array<i32: 0>} : vector<16x1xi32>
    %24 = vector.broadcast %22 : i32 to vector<16x1xi32>
    %25 = arith.addi %24, %23 : vector<16x1xi32>
    %c30_i32 = arith.constant 30 : i32
    %26 = vector.broadcast %c30_i32 : i32 to vector<16x1xi32>
    %27 = arith.cmpi slt, %25, %26 : vector<16x1xi32>
    %cst_7 = arith.constant 0.000000e+00 : f32
    %28 = vector.broadcast %cst_7 : f32 to vector<16x1xf32>
    %29 = arith.select %27, %21, %28 : vector<16x1xi1>, vector<16x1xf32>
    %30 = vector.shape_cast %29 : vector<16x1xf32> to vector<1x16x1xf32>
    %cst_8 = arith.constant dense<0.000000e+00> : vector<1xf32>
    %31 = vector.multi_reduction <add>, %30, %cst_8 [1, 2] : vector<1x16x1xf32> to vector<1xf32>
    %32 = vector.shape_cast %31 : vector<1xf32> to vector<1x1x1xf32>
    %33 = vector.extract %32[0, 0, 0] : f32 from vector<1x1x1xf32>
    %34 = vector.broadcast %33 : f32 to vector<1x1xf32>
    %35 = vector.shape_cast %34 : vector<1x1xf32> to vector<1x1x1xf32>
    %c0_9 = arith.constant 0 : index
    %c0_10 = arith.constant 0 : index
    %c0_11 = arith.constant 0 : index
    %36 = vector.load %arg3[%c0_9, %c0_10, %c0_11] : memref<1x1x1xf32, #tpu.memory_space<vmem>>, vector<1x1x1xf32>
    tpu.vector_store %arg3[%c0_9, %c0_10, %c0_11], %35 {strides = array<i32>} : memref<1x1x1xf32, #tpu.memory_space<vmem>>, vector<1x1x1xf32>,
    return
  }
  func.func @transform_0(%arg0: i32) -> (i32, i32) {
    %c0_i32 = arith.constant 0 : i32
    %c0_i32_0 = arith.constant 0 : i32
    return %arg0, %c0_i32 : i32, i32
  }
  func.func @transform_1(%arg0: i32) -> (i32, i32) {
    %c0_i32 = arith.constant 0 : i32
    %c0_i32_0 = arith.constant 0 : i32
    return %arg0, %c0_i32 : i32, i32
  }
  func.func @transform_2(%arg0: i32) -> (i32, i32, i32) {
    %c0_i32 = arith.constant 0 : i32
    %c0_i32_0 = arith.constant 0 : i32
    %c0_i32_1 = arith.constant 0 : i32
    return %arg0, %c0_i32, %c0_i32_0 : i32, i32, i32
  }
}

</mosaic_0001>

<bundles_post_ra>
// kernel: tpu_custom_call.1
= control target key start
LH: loop header
LB: loop body
LE: loop exit
PB: predicated region body
PF: predicated region fallthrough
CT: control target
= control target key end

     0   :  { %7 = vsyncpa [#allocation3], 0  ;;  %s621_s0 = inlined_call_operand.hbm [shape: f32[30,256], index: 0, kind: input, shape index: {}]   ;;  %s622_s1 = inlined_call_operand.vmem [shape: s32[32,1], index: 1, kind: input, shape index: {}]   ;;  %s623_s2 = inlined_call_operand.vmem [shape: f32[2,1,1], index: 2, kind: output, shape index: {}]  }
   0x1   :  { %9 = vsyncpa [#allocation3 + $0x1], 0  ;;  %s508_s9 = smov 0   ;;  %s510_s10 = smov 0  }
   0x2   :  { %s512_s11 = smov 0   ;;  %s514_s12 = smov 0  }
   0x3 LB: > { %s527_s13 = sadd.s32 4294967295, %s486_s12   ;;  %s530_s14 = sadd.s32 1, %s486_s12   ;;  %s486_s12 = sphi %s514_s12, %s630_s12   ;;  %s482_s11 = sphi %s512_s11, %s629_s11   ;;  %s478_s10 = sphi %s510_s10, %s628_s10   ;;  %s474_s9 = sphi %s508_s9, %s627_s9  }
   0x4   : > { %s19_s15 = ssub.s32 %s486_s12, %s530_s14  ;;  %s22_s16 = sadd.s32 1, %s482_s11 }
   0x5   : > { %p20_p0 = scmp.eq.s32.totalorder %s19_s15, 0  ;;  %p29_p1 = scmp.ne.s32.totalorder %s482_s11, %s478_s10 }
   0x6   : > { %p30_p2 = scmp.eq.s32.totalorder %s486_s12, 0  ;;  %p35_p3 = scmp.ne.s32.totalorder %s478_s10, %s474_s9 }
   0x7   : > { %s540_s17 = scalar_select %p20_p0, %s482_s11, %s22_s16  }
   0x8   : > { %p31_p4 = por %p30_p2, %p29_p1  ;;  %p36_p5 = scmp.eq.s32.totalorder %s527_s13, 0 }
   0x9   : > { %p371_p6 = scmp.lt.s32.totalorder %s486_s12, 2  ;;  %s111_s19 = sand.u32 1, %s482_s11  }
   0xa   : > { %p544_p7 = por %p36_p5, %p35_p3  ;;  %s350_s20 = sshll.u32 %s111_s19, 5 }
   0xb   : > { %s362_s21 = sshll.u32 %s486_s12, 9  ;;  %s115_s25 = scalar_lea.vmem [#allocation2], %s350_s20 }
   0xc   : > { %s553_s24 = scalar_lea.hbm %s621_s0, %s362_s21  ;;  %s123_s26 = sshll.u32 %s115_s25, 4  ;;  %s555_s26 = int_to_ptr.vmem [resolvable:$true] %s123_s26 }
   0xd   : > { %p557_p8 = pnand %p371_p6, %p31_p4  ;;  %s562_s28 = scalar_lea.sflag [#allocation3], %s111_s19 }
   0xe   : > { %s422_s29 = scalar_lea.hbm %s553_s24, 512  ;;  %s427_s4 = scalar_lea.hbm %s621_s0, 1024 }
   0xf   : > { %p423_p10 = scmp.ne.s32.totalorder %s553_s24, %s422_s29  ;;  %p424_p11 = pneg %p557_p8 }
  0x10   : > { %p428_p0 = scmp.lt.u32.totalorder %s553_s24, %s621_s0  ;;  %p429_p1 = scmp.lt.u32.totalorder %s427_s4, %s422_s29 }
  0x11   : > { %p425_p12 = pnand %p424_p11, %p423_p10  ;;  %p431_p3 = scmp.lt.u32.totalorder %s422_s29, %s553_s24 }
  0x12   : > { %p430_p2 = por %p429_p1, %p428_p0 }
  0x13   : > { %p426_p13 = pneg %p425_p12 }
  0x14   : > { %p432_p4 = por %p431_p3, %p430_p2 }
  0x16   : > { %p433_p5 = pnand %p432_p4, %p426_p13 }
  0x18   : > { %436 = shalt.err (!%p433_p5)
}
  0x19   : > { %s437_s7 = scalar_lea.vmem %s555_s26, 512  ;;  %s488_s8 = smov [#allocation2]  }
  0x1a   : > { %p438_p6 = scmp.ne.s32.totalorder %s555_s26, %s437_s7  ;;  %s442_s9 = sshll.u32 %s488_s8, 4  ;;  %s443_s9 = int_to_ptr.vmem [resolvable:$false] %s442_s9 }
  0x1b   : > { %s444_s15 = scalar_lea.vmem %s443_s9, 1024  ;;  %p445_p9 = scmp.lt.s32.totalorder %s555_s26, %s443_s9 }
  0x1c   : > { %p440_p10 = pnand %p438_p6, %p424_p11  ;;  %p446_p0 = scmp.lt.s32.totalorder %s444_s15, %s437_s7 }
  0x1e   : > { %p441_p12 = pneg %p440_p10  ;;  %p447_p1 = por %p446_p0, %p445_p9 }
  0x20   : > { %p448_p2 = pnand %p447_p1, %p441_p12 }
  0x22   : > { %451 = shalt.err (!%p448_p2)
}
  0x23   : > { %s489_s16 = smov 256   ;;  %s490_s19 = smov 16  }
  0x24   : > { %370 = dma.hbm_to_vmem [thread:$0]  (!%p557_p8), %s553_s24, 512, %s555_s26, %s562_s28, %s489_s16, %s489_s16, %s490_s19  }
  0x25   : > { %p140_p11 = scmp.lt.s32.totalorder %s486_s12, 3  ;;  %p626_p13 = scmp.ge.s32.totalorder %s486_s12, 1 }
  0x27   : > { %p141_p3 = pnand %p626_p13, %p140_p11 }
  0x28   : > { %s146_s20 = sand.u32 (!%p141_p3), 1, %s478_s10  }
  0x29   : > { %144 = sbr.rel (%p141_p3) target bundleno = 585 (0x249), region = 28  ;;  %s355_s21 = sshll.u32 (!%p141_p3), %s146_s20, 5 }
  0x2a   : > { %s147_s22 = scalar_lea.sflag (!%p141_p3), [#allocation3], %s146_s20  ;;  %s150_s23 = scalar_lea.vmem (!%p141_p3), [#allocation2], %s355_s21 }
  0x30   : > { %469 = dma.done.wait (%p544_p7), %s147_s22, 512  }
  0x31   : > { %471 = vsyncadd (%p544_p7), %s147_s22, 4294966784  ;;  %s356_s25 = sshll.u32 %s527_s13, 1  ;;  %v491_v0 = vmov 0   ;;  %v184_v1 = vld [vmem:[%s150_s23] sm:$0xff]  ;;  %v185_v2 = vld [vmem:[%s150_s23 + $0x8] sm:$0xff]  ;;  %v220_v9 = vlaneseq  ;;  %s358_s18 = sshll.u32 %s527_s13, 4 }
  0x32   : > { %408 = vset.pattern.permute.xlu1 %v491_v0  ;;  %p176_p8 = scmp.lt.s32.totalorder %s356_s25, 3  ;;  %409 = vset.pattern.permute.xlu0 %v491_v0  ;;  %v186_v3 = vld [vmem:[%s150_s23 + $0x10] sm:$0xff]  ;;  %v190_v4 = vmax.f32 %v184_v1, %v185_v2  ;;  %v187_v5 = vld [vmem:[%s150_s23 + $0x18] sm:$0xff]  ;;  %v492_v24 = vmov 0.000390625   ;;  %v253_v44 = vstv %s358_s18  ;;  %vm260_vm6 = vcmask 7168  }
  0x33   : > { %v193_v7 = vmax.f32 %v186_v3, %v187_v5  ;;  %v221_v13 = vand.u32 127, %v220_v9  ;;  %v251_v43 = vshrl.u32 %v220_v9, 7  ;;  %p181_p7 = scmp.lt.s32.totalorder %s527_s13, 1  ;;  %vm274_vm7 = vcmask 0  }
  0x34   : > { %s632_s25 = smov (!%p176_p8, %s356_s25), 3  ;;  %191 = vmax.xlane.f32.xlu0 %v190_v4 }
  0x35   : > { %s357_s12 = sshll.u32 %s632_s25, 3  ;;  %v222_v20 = vadd.s32 128, %v221_v13  ;;  %v252_v46 = vadd.s32 8, %v251_v43  ;;  %v254_v48 = vadd.s32 %v253_v44, %v251_v43  ;;  %s634_s13 = smov (!%p181_p7, %s527_s13), 1 }
  0x36   : > { %s179_s27 = scalar_lea.vmem %s622_s1, %s357_s12  ;;  %s183_s30 = scalar_lea.vmem %s623_s2, %s634_s13 }
  0x37   : > { %v188_v6 = vld [vmem:[%s179_s27] sm:$0xff]  ;;  %v189_v8 = vld [vmem:[%s179_s27 + $0x8] sm:$0xff]  ;;  %v255_v52 = vadd.s32 %v253_v44, %v252_v46  ;;  %vm256_vm4 = vcmp.lt.s32.totalorder %v254_v48, 30 }
  0x38   : > { %224 = vperm.xlu1 %408, %v188_v6   ;;  %194 = vmax.xlane.f32.xlu0 %v193_v7 }
  0x39   : > { %vm257_vm5 = vcmp.lt.s32.totalorder %v255_v52, 30 }
  0x3c   : > { %227 = vperm.xlu1 %408, %v189_v8  }
  0xb7   : > { %v225_v17 = vpop.permute.xlu1 %224 }
  0xb8   : > { %vm229_vm0 = vcmp.eq.s32.totalorder %v221_v13, %v225_v17  ;;  %vm230_vm1 = vcmp.eq.s32.totalorder %v222_v20, %v225_v17 }
  0xb9   : > { %v233_v25 = vsel %vm229_vm0, 0.9003906, %v492_v24  ;;  %v234_v26 = vsel %vm230_vm1, 0.9003906, %v492_v24 }
  0xba   : > { %v237_v28 = vmul.f32 %v233_v25, %v184_v1  ;;  %v238_v29 = vmul.f32 %v234_v26, %v185_v2 }
  0xbb   : > { %v228_v23 = vpop.permute.xlu1 %227 }
  0xbc   : > { %vm231_vm2 = vcmp.eq.s32.totalorder %v221_v13, %v228_v23  ;;  %vm232_vm3 = vcmp.eq.s32.totalorder %v222_v20, %v228_v23  ;;  %v241_v35 = vadd.f32 %v238_v29, %v237_v28 }
  0xbd   : > { %v235_v31 = vsel %vm231_vm2, 0.9003906, %v492_v24  ;;  %v236_v32 = vsel %vm232_vm3, 0.9003906, %v492_v24 }
  0xbe   : > { %v239_v36 = vmul.f32 %v235_v31, %v186_v3  ;;  %v240_v37 = vmul.f32 %v236_v32, %v187_v5 }
  0xc0   : > { %v244_v40 = vadd.f32 %v240_v37, %v239_v36 }
  0xc1   : > { %v192_v10 = vpop.xlane.xlu0 %191 }
  0xc2   : > { %v196_v11 = vsub.f32 %v184_v1, %v192_v10  ;;  %v197_v12 = vsub.f32 %v185_v2, %v192_v10 }
  0xc4   : > { %v200_v14 = vmul.f32 1.442695, %v196_v11  ;;  %v202_v15 = vmul.f32 1.442695, %v197_v12 }
  0xc5   : > { %v195_v16 = vpop.xlane.xlu0 %194 }
  0xc6   : > { %410 = vpow2.f32 %v200_v14  ;;  %v198_v18 = vsub.f32 %v186_v3, %v195_v16  ;;  %v199_v19 = vsub.f32 %v187_v5, %v195_v16 }
  0xc7   : > { %412 = vpow2.f32 %v202_v15 }
  0xc8   : > { %v204_v21 = vmul.f32 1.442695, %v198_v18  ;;  %v206_v22 = vmul.f32 1.442695, %v199_v19 }
  0xca   : > { %414 = vpow2.f32 %v204_v21 }
  0xcb   : > { %416 = vpow2.f32 %v206_v22 }
  0xd0   : > { %v411_v27 = vpop.eup %410 }
  0xd1   : > { %v413_v30 = vpop.eup %412 }
  0xd2   : > { %v208_v33 = vadd.f32 %v413_v30, %v411_v27 }
  0xd4   : > { %v415_v34 = vpop.eup %414  ;;  %209 = vadd.xlane.f32.xlu0 %v208_v33 }
  0xd5   : > { %v417_v38 = vpop.eup %416 }
  0xd6   : > { %v211_v39 = vadd.f32 %v417_v38, %v415_v34 }
  0xd8   : > { %212 = vadd.xlane.f32.xlu1 %v211_v39  ;;  %242 = vadd.xlane.f32.xlu0 %v241_v35 }
  0xdc   : > { %245 = vadd.xlane.f32.xlu0 %v244_v40 }
 0x161   : > { %v210_v41 = vpop.xlane.xlu0 %209 }
 0x162   : > { %418 = vlog2.f32 %v210_v41 }
 0x165   : > { %v213_v42 = vpop.xlane.xlu1 %212  ;;  %v243_v49 = vpop.xlane.xlu0 %242 }
 0x166   : > { %420 = vlog2.f32 %v213_v42 }
 0x169   : > { %v246_v56 = vpop.xlane.xlu0 %245 }
 0x16c   : > { %v419_v45 = vpop.eup %418 }
 0x16d   : > { %v215_v47 = vmul.f32 0.6931472, %v419_v45 }
 0x16f   : > { %v218_v50 = vadd.f32 %v215_v47, %v192_v10 }
 0x170   : > { %v421_v51 = vpop.eup %420 }
 0x171   : > { %v217_v53 = vmul.f32 0.6931472, %v421_v51  ;;  %v247_v54 = vsub.f32 %v218_v50, %v243_v49 }
 0x173   : > { %v219_v55 = vadd.f32 %v217_v53, %v195_v16  ;;  %v258_v57 = vsel %vm256_vm4, %v247_v54, 0.0 }
 0x174   : > { %v261_v60 = vsel %vm260_vm6, %v258_v57, 0.0 }
 0x175   : > { %v248_v58 = vsub.f32 %v219_v55, %v246_v56 }
 0x177   : > { %v259_v59 = vsel %vm257_vm5, %v248_v58, 0.0 }
 0x178   : > { %v262_v61 = vsel %vm260_vm6, %v259_v59, 0.0 }
 0x179   : > { %v263_v62 = vadd.f32 %v262_v61, %v261_v60 }
 0x17b   : > { %264 = vadd.xlane.f32.xlu0 %v263_v62 }
 0x208   : > { %v265_v63 = vpop.xlane.xlu0 %264 }
 0x209   : > { %v266_v0 = vrot.slane %v265_v63, 4 }
 0x20b   : > { %v267_v1 = vadd.f32 %v266_v0, %v265_v63 }
 0x20d   : > { %v268_v2 = vrot.slane %v267_v1, 2 }
 0x20f   : > { %v269_v3 = vadd.f32 %v268_v2, %v267_v1 }
 0x211   : > { %v270_v4 = vrot.slane %v269_v3, 1 }
 0x213   : > { %v271_v5 = vadd.f32 %v270_v4, %v269_v3 }
 0x215   : > { %363 = vpush %v271_v5 }
 0x246   : > { %s364_s3 = spop %363 }
 0x247   : > { %v273_v6 = vstv %s364_s3 }
 0x248   : > { %275 = vst.msk [vmem:[%s183_s30] sm:$0x1] %vm274_vm7, %v273_v6 }
 0x249 PF: > { %p12_p9 = scmp.ge.s32.totalorder %s530_s14, 4   ;;  %s627_s9 = smov %s478_s10 }
 0x24a   : > { %s628_s10 = smov %s482_s11  ;;  %s629_s11 = smov %s540_s17 }
 0x24b   : > { %s630_s12 = smov %s530_s14  ;;  %14 = sbr.rel (!%p12_p9) target bundleno = 3 (0x3), region = 71 }
 0x252   :  { %293 = vsyncpa [#allocation3], 1 }
 0x253   :  { %295 = vsyncpa [#allocation3 + $0x1], 1 }

</bundles_post_ra>
